<compile_context>
chip_gen: v7x
topology: tpu7x:2x2x1
jax: 0.10.0
libtpu: 0.0.40
codegen_flags: <defaults>
</compile_context>

<pallas_src>
import functools

import jax
import jax.numpy as jnp
from jax.experimental import pallas as pl
from jax.experimental.pallas import tpu as pltpu


def _round_up(x: int, m: int) -> int:
    return (x + m - 1) // m * m


def ffnn_kernel(x_ref, w1_ref, b1_ref, w2_ref, b2_ref, o_ref, *, num_classes: int):
    # x arrives raw (f32, unpadded D); cast to bf16 for the MXU in-kernel.
    x = x_ref[...].astype(w1_ref.dtype)

    # hidden = relu(x @ W1 + b1): (TB, D) @ (D, H_pad), f32 accumulate, f32 epilogue.
    h = jnp.dot(x, w1_ref[...], preferred_element_type=jnp.float32) + b1_ref[...]
    h = jnp.maximum(h, 0.0).astype(w2_ref.dtype)

    # logits over the lane-dense padded class dim: (TB, H_pad) @ (H_pad, O_pad).
    logits = jnp.dot(h, w2_ref[...], preferred_element_type=jnp.float32) + b2_ref[...]

    # Mask padded class lanes so they vanish in the softmax (exp underflows to 0).
    lane = jax.lax.broadcasted_iota(jnp.int32, logits.shape, dimension=1)
    logits = jnp.where(lane < num_classes, logits, jnp.float32(-1e30))

    # Numerically stable log_softmax over the last dim (exp/log land on the EUP).
    m = jnp.max(logits, axis=-1, keepdims=True)
    shifted = logits - m
    lse = jnp.log(jnp.sum(jnp.exp(shifted), axis=-1, keepdims=True))
    logp = shifted - lse

    # Narrow writeback: only the first o_ref.shape[-1] (= 8) lanes go to HBM.
    o_ref[...] = logp[:, : o_ref.shape[-1]].astype(o_ref.dtype)


def prepare_params(w1, b1, w2, b2, *, compute_dtype=jnp.bfloat16):
    """One-time pad/cast of the static parameters (hoisted out of the per-call path).

    Uses the x @ W + b convention: w1 (D, H), b1 (1, H), w2 (H, O), b2 (1, O).
    (nn.Linear weights are stored (out, in); transpose before calling.)
    """
    D, H = w1.shape
    O = w2.shape[1]
    H_pad = _round_up(H, 128)
    O_pad = _round_up(O, 128)
    w1p = jnp.zeros((D, H_pad), compute_dtype).at[:, :H].set(w1.astype(compute_dtype))
    b1p = jnp.zeros((1, H_pad), jnp.float32).at[:, :H].set(b1.astype(jnp.float32))
    w2p = jnp.zeros((H_pad, O_pad), compute_dtype).at[:H, :O].set(w2.astype(compute_dtype))
    b2p = jnp.zeros((1, O_pad), jnp.float32).at[:, :O].set(b2.astype(jnp.float32))
    return w1p, b1p, w2p, b2p


def _choose_batch_tile(B: int, tb_max: int) -> tuple[int, int]:
    # Multiple of 16 (bf16 sublane packing).  Aim for >= 2 grid steps so v7x's
    # two TensorCores can split the batch ("parallel") axis once B is big enough.
    B16 = _round_up(max(B, 1), 16)
    TB = max(16, min(tb_max, _round_up(pl.cdiv(B16, 2), 16)))
    B_pad = _round_up(B16, TB)
    return TB, B_pad


@functools.partial(jax.jit, static_argnames=("num_classes", "tb_max"))
def ffnn_forward(x, w1p, b1p, w2p, b2p, *, num_classes: int, tb_max: int = 1024):
    """x: (B, D) f32; padded params from prepare_params -> (B, num_classes) f32 log-probs."""
    B, D = x.shape
    H_pad = w1p.shape[1]
    O_pad = w2p.shape[1]
    O_store = _round_up(num_classes, 8)          # narrow lane-slab writeback (8 for O=5)

    TB, B_pad = _choose_batch_tile(B, tb_max)
    if B_pad != B:
        # Minimal batch-only pad (f32, unpadded D) so the grid divides evenly.
        x = jnp.pad(x, ((0, B_pad - B), (0, 0)))

    cost = pl.CostEstimate(
        flops=2 * B_pad * (D * H_pad + H_pad * O_pad),
        transcendentals=B_pad * (O_pad + 1),                   # per-row exps + log
        bytes_accessed=(B_pad * D * 4                          # raw f32 x
                        + D * H_pad * 2 + H_pad * 4            # W1 (bf16) + b1 (f32)
                        + H_pad * O_pad * 2 + O_pad * 4        # W2 (bf16) + b2 (f32)
                        + B_pad * O_store * 4),                # narrow f32 out
    )

    out = pl.pallas_call(
        functools.partial(ffnn_kernel, num_classes=num_classes),
        out_shape=jax.ShapeDtypeStruct((B_pad, O_store), jnp.float32),
        grid=(B_pad // TB,),
        in_specs=[
            pl.BlockSpec((TB, D), lambda i: (i, 0)),           # x moves with the grid
            pl.BlockSpec((D, H_pad), lambda i: (0, 0)),        # weights stay resident
            pl.BlockSpec((1, H_pad), lambda i: (0, 0)),
            pl.BlockSpec((H_pad, O_pad), lambda i: (0, 0)),
            pl.BlockSpec((1, O_pad), lambda i: (0, 0)),
        ],
        out_specs=pl.BlockSpec((TB, O_store), lambda i: (i, 0)),
        compiler_params=pltpu.CompilerParams(
            dimension_semantics=("parallel",),
            vmem_limit_bytes=16 * 1024 * 1024,
        ),
        cost_estimate=cost,
    )(x, w1p, b1p, w2p, b2p)

    # Slice away batch / class padding outside the kernel.
    return out[:B, :num_classes]


if __name__ == "__main__":
    # Small shapes consistent with the module: batch=8, input_dim=32, h=32, output_dim=5.
    B, D, H, O = 8, 32, 32, 5

    key = jax.random.PRNGKey(0)
    kx, kw1, kb1, kw2, kb2 = jax.random.split(key, 5)

    x = jax.random.normal(kx, (B, D), dtype=jnp.float32)
    # Deterministic parameter init (uniform, roughly matching nn.Linear scale),
    # already in x @ W + b layout.
    b1_bound = 1.0 / (D ** 0.5)
    b2_bound = 1.0 / (H ** 0.5)
    w1 = jax.random.uniform(kw1, (D, H), jnp.float32, -b1_bound, b1_bound)
    b1 = jax.random.uniform(kb1, (1, H), jnp.float32, -b1_bound, b1_bound)
    w2 = jax.random.uniform(kw2, (H, O), jnp.float32, -b2_bound, b2_bound)
    b2 = jax.random.uniform(kb2, (1, O), jnp.float32, -b2_bound, b2_bound)

    # One-time parameter preparation (pad + bf16 cast), hoisted out of the forward path.
    params = prepare_params(w1, b1, w2, b2)

    out = ffnn_forward(x, *params, num_classes=O)
    out = jax.block_until_ready(out)
    assert out.shape == (B, O)
    assert bool(jnp.all(jnp.isfinite(out)))

    # Reference 1: same bf16 casts + f32 accumulation (tight tolerance).
    xb, w1b, w2b = x.astype(jnp.bfloat16), w1.astype(jnp.bfloat16), w2.astype(jnp.bfloat16)
    ref_h = jnp.maximum(jnp.dot(xb, w1b, preferred_element_type=jnp.float32) + b1, 0.0)
    ref_logits = jnp.dot(ref_h.astype(jnp.bfloat16), w2b,
                         preferred_element_type=jnp.float32) + b2
    ref_bf16 = jax.nn.log_softmax(ref_logits, axis=-1)
    assert jnp.allclose(out, ref_bf16, atol=2e-3, rtol=2e-3), "mismatch vs bf16 reference"

    # Reference 2: full f32 math (loose tolerance; bounds the bf16 quantization error).
    ref_f32 = jax.nn.log_softmax(jnp.maximum(x @ w1 + b1, 0.0) @ w2 + b2, axis=-1)
    assert jnp.allclose(out, ref_f32, atol=5e-2, rtol=0.0), "mismatch vs f32 reference"

    # TODO(synk): compute_Loss (NLLLoss) is a training-time loss, not part of forward.
    print("KERNEL_OK")
</pallas_src>

<mosaic_0001>
module attributes {stable_mosaic.version = 11 : i64} {
  func.func @ffnn_kernel(%arg0: i32, %arg1: memref<16x32xf32, #tpu.memory_space<vmem>>, %arg2: memref<32x128xbf16, #tpu.memory_space<vmem>>, %arg3: memref<1x128xf32, #tpu.memory_space<vmem>>, %arg4: memref<128x128xbf16, #tpu.memory_space<vmem>>, %arg5: memref<1x128xf32, #tpu.memory_space<vmem>>, %arg6: memref<16x8xf32, #tpu.memory_space<vmem>>) attributes {dimension_semantics = [#tpu.dimension_semantics<parallel>], iteration_bounds = array<i64: 1>, scalar_prefetch = 0 : i64, scratch_operands = 0 : i64, tpu.core_type = #tpu.core_type<tc>, window_params = [{transform_indices = @transform_0, window_bounds = array<i64: 16, 32>}, {pipeline_mode = #tpu.pipeline_mode<synchronous>, transform_indices = @transform_1, window_bounds = array<i64: 32, 128>}, {pipeline_mode = #tpu.pipeline_mode<synchronous>, transform_indices = @transform_2, window_bounds = array<i64: 1, 128>}, {pipeline_mode = #tpu.pipeline_mode<synchronous>, transform_indices = @transform_3, window_bounds = array<i64: 128, 128>}, {pipeline_mode = #tpu.pipeline_mode<synchronous>, transform_indices = @transform_4, window_bounds = array<i64: 1, 128>}, {transform_indices = @transform_5, window_bounds = array<i64: 16, 8>}]} {
    %c0 = arith.constant 0 : index
    %c0_0 = arith.constant 0 : index
    %0 = vector.load %arg1[%c0, %c0_0] : memref<16x32xf32, #tpu.memory_space<vmem>>, vector<16x32xf32>
    %1 = arith.truncf %0 : vector<16x32xf32> to vector<16x32xbf16>
    %c0_1 = arith.constant 0 : index
    %c0_2 = arith.constant 0 : index
    %2 = vector.load %arg2[%c0_1, %c0_2] : memref<32x128xbf16, #tpu.memory_space<vmem>>, vector<32x128xbf16>
    %cst = arith.constant dense<0.000000e+00> : vector<16x128xf32>
    %3 = tpu.matmul %1, %2, %cst {dimension_numbers = #tpu.dot_dimension_numbers<[1], [0], [0], [1], [0, 0, 1, 1], [], []>} : vector<16x32xbf16>, vector<32x128xbf16>, vector<16x128xf32> -> vector<16x128xf32>
    %c0_3 = arith.constant 0 : index
    %c0_4 = arith.constant 0 : index
    %4 = vector.load %arg3[%c0_3, %c0_4] : memref<1x128xf32, #tpu.memory_space<vmem>>, vector<1x128xf32>
    %5 = vector.broadcast %4 : vector<1x128xf32> to vector<16x128xf32>
    %6 = arith.addf %3, %5 : vector<16x128xf32>
    %cst_5 = arith.constant 0.000000e+00 : f32
    %7 = vector.broadcast %cst_5 : f32 to vector<16x128xf32>
    %8 = arith.maximumf %6, %7 : vector<16x128xf32>
    %9 = arith.truncf %8 : vector<16x128xf32> to vector<16x128xbf16>
    %c0_6 = arith.constant 0 : index
    %c0_7 = arith.constant 0 : index
    %10 = vector.load %arg4[%c0_6, %c0_7] : memref<128x128xbf16, #tpu.memory_space<vmem>>, vector<128x128xbf16>
    %cst_8 = arith.constant dense<0.000000e+00> : vector<16x128xf32>
    %11 = tpu.matmul %9, %10, %cst_8 {dimension_numbers = #tpu.dot_dimension_numbers<[1], [0], [0], [1], [0, 0, 1, 1], [], []>} : vector<16x128xbf16>, vector<128x128xbf16>, vector<16x128xf32> -> vector<16x128xf32>
    %c0_9 = arith.constant 0 : index
    %c0_10 = arith.constant 0 : index
    %12 = vector.load %arg5[%c0_9, %c0_10] : memref<1x128xf32, #tpu.memory_space<vmem>>, vector<1x128xf32>
    %13 = vector.broadcast %12 : vector<1x128xf32> to vector<16x128xf32>
    %14 = arith.addf %11, %13 : vector<16x128xf32>
    %15 = tpu.iota {dimensions = array<i32: 1>} : vector<16x128xi32>
    %c5_i32 = arith.constant 5 : i32
    %16 = vector.broadcast %c5_i32 : i32 to vector<16x128xi32>
    %17 = arith.cmpi slt, %15, %16 : vector<16x128xi32>
    %cst_11 = arith.constant -1.000000e+30 : f32
    %18 = vector.broadcast %cst_11 : f32 to vector<16x128xf32>
    %19 = arith.select %17, %14, %18 : vector<16x128xi1>, vector<16x128xf32>
    %cst_12 = arith.constant dense<0xFF800000> : vector<16xf32>
    %20 = vector.multi_reduction <maximumf>, %19, %cst_12 [1] : vector<16x128xf32> to vector<16xf32>
    %21 = vector.shape_cast %20 : vector<16xf32> to vector<16x1xf32>
    %22 = vector.broadcast %21 : vector<16x1xf32> to vector<16x128xf32>
    %23 = arith.subf %19, %22 : vector<16x128xf32>
    %24 = math.exp %23 : vector<16x128xf32>
    %cst_13 = arith.constant dense<0.000000e+00> : vector<16xf32>
    %25 = vector.multi_reduction <add>, %24, %cst_13 [1] : vector<16x128xf32> to vector<16xf32>
    %26 = vector.shape_cast %25 : vector<16xf32> to vector<16x1xf32>
    %27 = math.log %26 : vector<16x1xf32>
    %28 = vector.broadcast %27 : vector<16x1xf32> to vector<16x128xf32>
    %29 = arith.subf %23, %28 : vector<16x128xf32>
    %30 = vector.extract_strided_slice %29 {offsets = [0, 0], sizes = [16, 8], strides = [1, 1]} : vector<16x128xf32> to vector<16x8xf32>
    %c0_14 = arith.constant 0 : index
    %c0_15 = arith.constant 0 : index
    %31 = vector.load %arg6[%c0_14, %c0_15] : memref<16x8xf32, #tpu.memory_space<vmem>>, vector<16x8xf32>
    tpu.vector_store %arg6[%c0_14, %c0_15], %30 {strides = array<i32>} : memref<16x8xf32, #tpu.memory_space<vmem>>, vector<16x8xf32>,
    return
  }
  func.func @transform_0(%arg0: i32) -> (i32, i32) {
    %c0_i32 = arith.constant 0 : i32
    %c0_i32_0 = arith.constant 0 : i32
    return %arg0, %c0_i32 : i32, i32
  }
  func.func @transform_1(%arg0: i32) -> (i32, i32) {
    %c0_i32 = arith.constant 0 : i32
    %c0_i32_0 = arith.constant 0 : i32
    %c0_i32_1 = arith.constant 0 : i32
    return %c0_i32, %c0_i32_0 : i32, i32
  }
  func.func @transform_2(%arg0: i32) -> (i32, i32) {
    %c0_i32 = arith.constant 0 : i32
    %c0_i32_0 = arith.constant 0 : i32
    %c0_i32_1 = arith.constant 0 : i32
    return %c0_i32, %c0_i32_0 : i32, i32
  }
  func.func @transform_3(%arg0: i32) -> (i32, i32) {
    %c0_i32 = arith.constant 0 : i32
    %c0_i32_0 = arith.constant 0 : i32
    %c0_i32_1 = arith.constant 0 : i32
    return %c0_i32, %c0_i32_0 : i32, i32
  }
  func.func @transform_4(%arg0: i32) -> (i32, i32) {
    %c0_i32 = arith.constant 0 : i32
    %c0_i32_0 = arith.constant 0 : i32
    %c0_i32_1 = arith.constant 0 : i32
    return %c0_i32, %c0_i32_0 : i32, i32
  }
  func.func @transform_5(%arg0: i32) -> (i32, i32) {
    %c0_i32 = arith.constant 0 : i32
    %c0_i32_0 = arith.constant 0 : i32
    return %arg0, %c0_i32 : i32, i32
  }
}

</mosaic_0001>

<bundles_post_ra>
// kernel: ffnn_forward.1
= control target key start
LH: loop header
LB: loop body
LE: loop exit
PB: predicated region body
PF: predicated region fallthrough
CT: control target
= control target key end

     0   :  { %10 = vsyncpa [#allocation3], 0  ;;  %s354_s18 = smov [#allocation2]   ;;  %s425_s0 = inlined_call_operand.vmem [shape: f32[16,32], index: 0, kind: input, shape index: {}]   ;;  %s426_s1 = inlined_call_operand.vmem [shape: bf16[32,128], index: 1, kind: input, shape index: {}]   ;;  %s427_s2 = inlined_call_operand.vmem [shape: f32[1,128], index: 2, kind: input, shape index: {}]   ;;  %s428_s3 = inlined_call_operand.hbm [shape: bf16[128,128], index: 3, kind: input, shape index: {}]   ;;  %s429_s4 = inlined_call_operand.vmem [shape: f32[1,128], index: 4, kind: input, shape index: {}]   ;;  %s430_s5 = inlined_call_operand.vmem [shape: f32[16,8], index: 5, kind: output, shape index: {}]  }
   0x1   :  { %s22_s19 = sshll.u32 %s354_s18, 4  ;;  %s330_s22 = scalar_lea.hbm %s428_s3, 1024  ;;  %s23_s19 = int_to_ptr.vmem [resolvable:$true] %s22_s19 }
   0x2   :  { %p331_p0 = scmp.ne.s32.totalorder %s428_s3, %s330_s22  ;;  %p334_p1 = scmp.lt.u32.totalorder %s330_s22, %s428_s3 }
   0x4   :  { %p336_p2 = pnand %p334_p1, %p331_p0 }
   0x6   :  { %339 = shalt.err (!%p336_p2)
}
   0x7   :  { %s340_s27 = scalar_lea.vmem %s23_s19, 1024  ;;  %p345_p4 = scmp.lt.s32.totalorder %s23_s19, %s23_s19 }
   0x8   :  { %p341_p3 = scmp.ne.s32.totalorder %s23_s19, %s340_s27  ;;  %p346_p5 = scmp.lt.s32.totalorder %s340_s27, %s340_s27 }
   0xa   :  { %p347_p6 = por %p346_p5, %p345_p4 }
   0xc   :  { %p348_p7 = pnand %p347_p6, %p341_p3 }
   0xe   :  { %351 = shalt.err (!%p348_p7)
}
   0xf   :  { %s355_s28 = smov 64   ;;  %s356_s29 = smov 4  }
  0x10   :  { %28 = dma.hbm_to_vmem [thread:$0]  %s428_s3, 1024, %s23_s19, [#allocation3], %s355_s28, %s355_s28, %s356_s29  }
  0x11   :  { %352 = dma.done.wait [#allocation3], 1024  }
  0x12   :  { %353 = vsyncadd [#allocation3], 4294966272  ;;  %v357_v0 = vmov 0.0   ;;  %vm358_vm0 = vmmov 0   ;;  %v312_v1 = vld [vmem:[%s426_s1] sm:$0xff]   ;;  %v313_v2 = vld [vmem:[%s426_s1 + $0x8] sm:$0xff]   ;;  %v221_v24 = vlaneseq }
  0x13   :  { %279 = vmatprep.subr.bf16.mxu0 %v357_v0  ;;  %283 = vmatprep.mubr.msk.bf16.mxu0 %vm358_vm0, %v357_v0  ;;  %v35_v3 = vld [vmem:[%s425_s0] sm:$0xff]  ;;  %v36_v4 = vld [vmem:[%s425_s0 + $0x8] sm:$0xff]  ;;  %v314_v5 = vld [vmem:[#allocation2] sm:$0xff]   ;;  %vm61_vm1 = vcmask 261120   ;;  %vm246_vm3 = vcmask 64512  }
  0x14   :  { %287 = vmatprep.subr.bf16.mxu1 %v357_v0  ;;  %303 = vmatprep.mubr.msk.bf16.mxu1 %vm358_vm0, %v357_v0  ;;  %v37_v6 = vpack.c.bf16 %v36_v4, %v35_v3  ;;  %v315_v7 = vld [vmem:[#allocation2 + $0x8] sm:$0xff]   ;;  %v316_v8 = vld [vmem:[#allocation2 + $0x10] sm:$0xff]   ;;  %v317_v9 = vld [vmem:[#allocation2 + $0x18] sm:$0xff]   ;;  %v222_v25 = vand.u32 127, %v221_v24 }
  0x15   :  { %280 = vmatpush3.bf16.msra.mxu0 %v312_v1  ;;  %288 = vmatpush3.bf16.msra.mxu1 %v314_v5  ;;  %v318_v10 = vld [vmem:[#allocation2 + $0x20] sm:$0xff]   ;;  %v319_v11 = vld [vmem:[#allocation2 + $0x28] sm:$0xff]   ;;  %v320_v12 = vld [vmem:[#allocation2 + $0x30] sm:$0xff]  }
  0x16   :  { %281 = vmatprep.subr.bf16.mxu0 %v357_v0  ;;  %289 = vmatprep.subr.bf16.mxu1 %v357_v0  ;;  %v321_v13 = vld [vmem:[#allocation2 + $0x38] sm:$0xff]   ;;  %v254_v14 = vld [vmem:[%s427_s2] ss:$0 sm:$0xff]  ;;  %vm223_vm2 = vcmp.lt.s32.totalorder %v222_v25, 5 }
  0x17   :  { %v258_v26 = vld [vmem:[%s429_s4] ss:$0 sm:$0xff] }
  0x19   :  { %282 = vmatpush3.bf16.msra.mxu0 %v313_v2  ;;  %290 = vmatpush3.bf16.msra.mxu1 %v315_v7 }
  0x1a   :  { %291 = vmatprep.subr.bf16.mxu1 %v357_v0 }
  0x1c   :  { %284 = vmatmul.mubr.msk.bf16.vlgmr.msra.gmra.mrb[0].mxu0 %vm61_vm1, %v37_v6 }
  0x1d   :  { %292 = vmatpush3.bf16.msra.mxu1 %v316_v8 }
  0x1e   :  { %293 = vmatprep.subr.bf16.mxu1 %v357_v0 }
  0x21   :  { %294 = vmatpush3.bf16.msra.mxu1 %v317_v9 }
  0x22   :  { %295 = vmatprep.subr.bf16.mxu1 %v357_v0 }
  0x25   :  { %296 = vmatpush3.bf16.msra.mxu1 %v318_v10 }
  0x26   :  { %297 = vmatprep.subr.bf16.mxu1 %v357_v0 }
  0x29   :  { %298 = vmatpush3.bf16.msra.mxu1 %v319_v11 }
  0x2a   :  { %299 = vmatprep.subr.bf16.mxu1 %v357_v0 }
  0x2d   :  { %300 = vmatpush3.bf16.msra.mxu1 %v320_v12 }
  0x2e   :  { %301 = vmatprep.subr.bf16.mxu1 %v357_v0 }
  0x31   :  { %302 = vmatpush3.bf16.msra.mxu1 %v321_v13 }
  0xef   :  { %v99_v15 = vpop.f32.mrb[0].mxu0 }
  0xf0   :  { %v100_v16 = vadd.f32 %v254_v14, %v99_v15  ;;  %v285_v17 = vpop.f32.mrb[1].mxu0 }
  0xf1   :  { %v102_v18 = vpop.f32.mrb[2].mxu0 }
  0xf2   :  { %v103_v19 = vadd.f32 %v254_v14, %v102_v18  ;;  %v286_v20 = vpop.f32.mrb[3].mxu0  ;;  %v106_v21 = vmax.f32 %v100_v16, 0.0 }
  0xf4   :  { %v107_v22 = vmax.f32 %v103_v19, 0.0 }
  0xf6   :  { %v108_v23 = vpack.c.bf16 %v107_v22, %v106_v21 }
  0xf8   :  { %304 = vmatmul.mubr.bf16.vlgmr.msra.gmra.mrb[0].mxu1 %v108_v23 }
 0x1cb   :  { %v214_v27 = vpop.f32.mrb[0].mxu1 }
 0x1cc   :  { %v215_v28 = vadd.f32 %v258_v26, %v214_v27  ;;  %v305_v29 = vpop.f32.mrb[1].mxu1 }
 0x1cd   :  { %v217_v30 = vpop.f32.mrb[2].mxu1 }
 0x1ce   :  { %v218_v31 = vadd.f32 %v258_v26, %v217_v30  ;;  %v306_v32 = vpop.f32.mrb[3].mxu1  ;;  %v224_v33 = vsel %vm223_vm2, %v215_v28, -1e+30 }
 0x1cf   :  { %226 = vmax.xlane.f32.xlu0 %v224_v33 }
 0x1d0   :  { %v225_v34 = vsel %vm223_vm2, %v218_v31, -1e+30 }
 0x1d3   :  { %228 = vmax.xlane.f32.xlu0 %v225_v34 }
 0x25c   :  { %v227_v35 = vpop.xlane.xlu0 %226 }
 0x25d   :  { %v230_v36 = vsub.f32 %v224_v33, %v227_v35 }
 0x25f   :  { %v232_v37 = vmul.f32 1.442695, %v230_v36 }
 0x260   :  { %v229_v38 = vpop.xlane.xlu0 %228 }
 0x261   :  { %v231_v39 = vsub.f32 %v225_v34, %v229_v38  ;;  %322 = vpow2.f32 %v232_v37 }
 0x263   :  { %v234_v40 = vmul.f32 1.442695, %v231_v39 }
 0x265   :  { %324 = vpow2.f32 %v234_v40 }
 0x26b   :  { %v323_v41 = vpop.eup %322 }
 0x26c   :  { %236 = vadd.xlane.f32.xlu1 %v323_v41 }
 0x26f   :  { %v325_v42 = vpop.eup %324 }
 0x270   :  { %238 = vadd.xlane.f32.xlu1 %v325_v42 }
 0x2f9   :  { %v237_v43 = vpop.xlane.xlu1 %236 }
 0x2fa   :  { %326 = vlog2.f32 %v237_v43 }
 0x2fd   :  { %v239_v44 = vpop.xlane.xlu1 %238 }
 0x2fe   :  { %328 = vlog2.f32 %v239_v44 }
 0x304   :  { %v327_v45 = vpop.eup %326 }
 0x305   :  { %v241_v46 = vmul.f32 0.6931472, %v327_v45 }
 0x307   :  { %v244_v47 = vsub.f32 %v230_v36, %v241_v46 }
 0x308   :  { %v329_v48 = vpop.eup %328 }
 0x309   :  { %247 = vst.msk [vmem:[%s430_s5] sm:$0xff] %vm246_vm3, %v244_v47  ;;  %v243_v49 = vmul.f32 0.6931472, %v329_v48 }
 0x30b   :  { %v245_v50 = vsub.f32 %v231_v39, %v243_v49 }
 0x30d   :  { %248 = vst.msk [vmem:[%s430_s5 + $0x8] sm:$0xff] %vm246_vm3, %v245_v50 }
 0x30e   :  { %253 = vsyncpa [#allocation3], 1 }

</bundles_post_ra>
